<compile_context>
chip_gen: v7x
topology: tpu7x:2x2x1
jax: 0.10.0
libtpu: 0.0.40
codegen_flags: <defaults>
</compile_context>

<pallas_src>
import functools

import jax
import jax.numpy as jnp
from jax.experimental import pallas as pl
from jax.experimental.pallas import tpu as pltpu


# ---------------------------------------------------------------------------
# Kernels
# ---------------------------------------------------------------------------
def _rsoftmax_kernel(x_ref, o_ref, *, radix, groups, inner):
    """Softmax over the radix axis with the (g,r)->(r,g) transpose folded in.

    x_ref / o_ref: (TB, groups*radix*inner) lane-major blocks.
      input  lane layout: (g, r, i) -> offset (g*radix + r)*inner + i
      output lane layout: (r, g, i) -> offset (r*groups + g)*inner + i
    All math is elementwise on the VPU/EUP (no cross-lane reduction): the R
    "rows" of the softmax are R separate lane slabs.
    """
    approx = jnp.dtype(o_ref.dtype) == jnp.dtype(jnp.bfloat16)
    # outs[r][g]: f32 (TB, inner) result destined for output slab (r, g).
    outs = [[None] * groups for _ in range(radix)]

    for g in range(groups):
        base = g * radix * inner
        if radix == 2:
            # Pairwise sigmoid: softmax over 2 entries == sigmoid(x0 - x1).
            x0 = x_ref[:, base: base + inner].astype(jnp.float32)
            x1 = x_ref[:, base + inner: base + 2 * inner].astype(jnp.float32)
            p0 = pl.reciprocal(1.0 + jnp.exp(x1 - x0), approx=approx)
            outs[0][g] = p0
            outs[1][g] = 1.0 - p0
        else:
            slabs = [
                x_ref[:, base + r * inner: base + (r + 1) * inner].astype(jnp.float32)
                for r in range(radix)
            ]
            m = slabs[0]
            for r in range(1, radix):
                m = jnp.maximum(m, slabs[r])
            denom = None
            for r in range(radix):
                e = jnp.exp(slabs[r] - m)
                slabs[r] = e                      # overwrite in place
                denom = e if denom is None else denom + e
            inv = pl.reciprocal(denom, approx=approx)
            for r in range(radix):
                outs[r][g] = slabs[r] * inv

    # One lane-dense, full-width store in output (r-major, g-minor) order.
    parts = [outs[r][g] for r in range(radix) for g in range(groups)]
    block = parts[0] if len(parts) == 1 else jnp.concatenate(parts, axis=-1)
    o_ref[...] = block.astype(o_ref.dtype)


def _sigmoid_kernel(x_ref, o_ref):
    approx = jnp.dtype(o_ref.dtype) == jnp.dtype(jnp.bfloat16)
    x = x_ref[...].astype(jnp.float32)
    o_ref[...] = pl.reciprocal(1.0 + jnp.exp(-x), approx=approx).astype(o_ref.dtype)


# ---------------------------------------------------------------------------
# Tiling heuristics
# ---------------------------------------------------------------------------
def _tpu_vmem_capacity_bytes():
    try:
        return int(pltpu.get_tpu_info().vmem_capacity_bytes)
    except Exception:
        return 64 * 1024 * 1024  # conservative: v7x per-TensorCore VMEM


def _tile_params(dtype):
    """(sublane multiple, per-buffer tile target bytes, vmem_limit_bytes)."""
    itemsize = jnp.dtype(dtype).itemsize
    sublane = max(8, 32 // max(1, itemsize))      # 8 f32, 16 bf16, 32 int8
    vmem = _tpu_vmem_capacity_bytes()
    if vmem <= 64 * 1024 * 1024:                  # v7x-class
        target_bytes = 3 << 20
        vmem_limit = 48 << 20
    else:                                         # v5e / v6e (128 MiB)
        target_bytes = 4 << 20
        vmem_limit = 64 << 20
    return sublane, target_bytes, vmem_limit


def _batch_tile(batch, row_bytes, sublane, target_bytes, block_batch=None):
    """Batch tile: large (target_bytes), sublane-aligned, multi-step grid."""
    if block_batch is not None:
        return max(1, min(int(block_batch), batch))
    tb = max(1, target_bytes // max(1, row_bytes))
    tb = max(sublane, (tb // sublane) * sublane)
    # Guarantee a multi-step grid (DMA pipelining + dual-TC sharding on v7x)
    # whenever the batch allows at least two sublane-aligned tiles; push to 4
    # steps when there is enough data to keep blocks reasonably large.
    if batch >= 2 * sublane:
        min_steps = 4 if (batch >= 4 * sublane and batch * row_bytes >= (4 << 20)) else 2
        cap = max(sublane, (pl.cdiv(batch, min_steps) // sublane) * sublane)
        tb = min(tb, cap)
    if tb >= batch:
        return batch
    return tb


# ---------------------------------------------------------------------------
# Public wrapper
# ---------------------------------------------------------------------------
def rsoftmax(x, radix, groups, *, block_batch=None):
    """Forward pass of RSoftmax.

    Args:
      x: NCHW array (B, C, H, W) (in SplitAttentionConv2d, H = W = 1).
      radix, groups: module config (Python ints).
      block_batch: optional override of the batch tile size (testing / tuning).

    Returns:
      radix > 1 : (B, C*H*W) array (matches torch's `.reshape(batch, -1)`).
      radix == 1: array with the same shape as `x` (matches torch.sigmoid).
    """
    batch = x.shape[0]
    total = 1
    for d in x.shape[1:]:
        total *= d

    x2 = x.reshape(batch, total)  # free reshape: no transpose, no extra HBM pass
    sublane, target_bytes, vmem_limit = _tile_params(x.dtype)
    row_bytes = total * jnp.dtype(x.dtype).itemsize
    tb = _batch_tile(batch, row_bytes, sublane, target_bytes, block_batch)
    grid = (pl.cdiv(batch, tb),)
    spec = pl.BlockSpec((tb, total), lambda i: (i, 0))
    cparams = pltpu.CompilerParams(
        dimension_semantics=("parallel",),
        vmem_limit_bytes=vmem_limit,
    )

    if radix > 1:
        if total % (radix * groups) != 0:
            raise ValueError("C*H*W must be divisible by radix*groups")
        inner = total // (radix * groups)
        kernel = functools.partial(
            _rsoftmax_kernel, radix=radix, groups=groups, inner=inner)
        out = pl.pallas_call(
            kernel,
            out_shape=jax.ShapeDtypeStruct((batch, total), x.dtype),
            grid=grid,
            in_specs=[spec],
            out_specs=spec,
            compiler_params=cparams,
        )(x2)
        return out  # (B, C*H*W), already in torch's post-transpose layout
    else:
        out = pl.pallas_call(
            _sigmoid_kernel,
            out_shape=jax.ShapeDtypeStruct((batch, total), x.dtype),
            grid=grid,
            in_specs=[spec],
            out_specs=spec,
            compiler_params=cparams,
        )(x2)
        return out.reshape(x.shape)  # torch.sigmoid keeps the input shape


# ---------------------------------------------------------------------------
# Pure-JAX reference (mirrors the torch module)
# ---------------------------------------------------------------------------
def _reference(x, radix, groups):
    batch = x.shape[0]
    if radix > 1:
        xr = x.reshape(batch, groups, radix, -1)
        xr = jnp.transpose(xr, (0, 2, 1, 3))
        xr = jax.nn.softmax(xr.astype(jnp.float32), axis=1).astype(x.dtype)
        return xr.reshape(batch, -1)
    return jax.nn.sigmoid(x.astype(jnp.float32)).astype(x.dtype)


if __name__ == "__main__":
    key = jax.random.PRNGKey(0)
    keys = jax.random.split(key, 6)

    # Case 1: radix=2, groups=2, inner=128 -> C=512, batch=16.  Force a batch
    # tile of 8 so the 'parallel' batch grid has 2 steps.
    radix, groups, inner = 2, 2, 128
    C = radix * groups * inner
    x = jax.random.normal(keys[0], (16, C, 1, 1), dtype=jnp.float32)
    out = jax.block_until_ready(rsoftmax(x, radix, groups, block_batch=8))
    ref = _reference(x, radix, groups)
    assert out.shape == (16, C)
    assert jnp.allclose(out, ref, atol=1e-5, rtol=1e-5), "radix=2 grid path mismatch"

    # Case 2: radix=2, groups=1, inner=64 (inner % 128 != 0 -> lane-dense
    # concatenated store path).
    radix, groups, inner = 2, 1, 64
    C = radix * groups * inner
    x = jax.random.normal(keys[1], (4, C, 1, 1), dtype=jnp.float32)
    out = jax.block_until_ready(rsoftmax(x, radix, groups))
    ref = _reference(x, radix, groups)
    assert out.shape == (4, C)
    assert jnp.allclose(out, ref, atol=1e-5, rtol=1e-5), "groups=1 path mismatch"

    # Case 3: general radix path (radix=4, groups=2, inner=32).
    radix, groups, inner = 4, 2, 32
    C = radix * groups * inner
    x = jax.random.normal(keys[2], (8, C, 1, 1), dtype=jnp.float32)
    out = jax.block_until_ready(rsoftmax(x, radix, groups))
    ref = _reference(x, radix, groups)
    assert out.shape == (8, C)
    assert jnp.allclose(out, ref, atol=1e-5, rtol=1e-5), "radix=4 path mismatch"

    # Case 4: partial last batch block (batch=12, tile=8).
    radix, groups, inner = 2, 2, 128
    C = radix * groups * inner
    x = jax.random.normal(keys[3], (12, C, 1, 1), dtype=jnp.float32)
    out = jax.block_until_ready(rsoftmax(x, radix, groups, block_batch=8))
    ref = _reference(x, radix, groups)
    assert out.shape == (12, C)
    assert jnp.allclose(out, ref, atol=1e-5, rtol=1e-5), "partial block mismatch"

    # Case 5: bf16 input/output (approx EUP reciprocal + sublane-16 tiles).
    radix, groups, inner = 2, 1, 128
    C = radix * groups * inner
    x = jax.random.normal(keys[4], (8, C, 1, 1), dtype=jnp.bfloat16)
    out = jax.block_until_ready(rsoftmax(x, radix, groups))
    ref = _reference(x, radix, groups)
    assert out.shape == (8, C)
    assert jnp.allclose(out.astype(jnp.float32), ref.astype(jnp.float32),
                        atol=1e-2, rtol=1e-2), "bf16 path mismatch"

    # Case 6: radix == 1 -> sigmoid, output keeps the NCHW input shape.
    x1 = jax.random.normal(keys[5], (2, 128, 1, 1), dtype=jnp.float32)
    out1 = jax.block_until_ready(rsoftmax(x1, 1, 2))
    ref1 = _reference(x1, 1, 2)
    assert out1.shape == x1.shape
    assert jnp.allclose(out1, ref1, atol=1e-5, rtol=1e-5), "sigmoid path mismatch"

    print("KERNEL_OK")
</pallas_src>

<mosaic_0001>
module attributes {stable_mosaic.version = 11 : i64} {
  func.func @_rsoftmax_kernel(%arg0: i32, %arg1: memref<8x512xf32, #tpu.memory_space<vmem>>, %arg2: memref<8x512xf32, #tpu.memory_space<vmem>>) attributes {dimension_semantics = [#tpu.dimension_semantics<parallel>], iteration_bounds = array<i64: 2>, scalar_prefetch = 0 : i64, scratch_operands = 0 : i64, tpu.core_type = #tpu.core_type<tc>, window_params = [{transform_indices = @transform_0, window_bounds = array<i64: 8, 512>}, {transform_indices = @transform_1, window_bounds = array<i64: 8, 512>}]} {
    %c0 = arith.constant 0 : index
    %c0_0 = arith.constant 0 : index
    %0 = vector.load %arg1[%c0, %c0_0] : memref<8x512xf32, #tpu.memory_space<vmem>>, vector<8x128xf32>
    %c0_1 = arith.constant 0 : index
    %c128 = arith.constant 128 : index
    %1 = vector.load %arg1[%c0_1, %c128] : memref<8x512xf32, #tpu.memory_space<vmem>>, vector<8x128xf32>
    %2 = arith.subf %1, %0 : vector<8x128xf32>
    %3 = math.exp %2 : vector<8x128xf32>
    %cst = arith.constant 1.000000e+00 : f32
    %4 = vector.broadcast %cst : f32 to vector<8x128xf32>
    %5 = arith.addf %4, %3 : vector<8x128xf32>
    %6 = tpu.reciprocal %5 : vector<8x128xf32> -> vector<8x128xf32>
    %cst_2 = arith.constant 1.000000e+00 : f32
    %7 = vector.broadcast %cst_2 : f32 to vector<8x128xf32>
    %8 = arith.subf %7, %6 : vector<8x128xf32>
    %c0_3 = arith.constant 0 : index
    %c256 = arith.constant 256 : index
    %9 = vector.load %arg1[%c0_3, %c256] : memref<8x512xf32, #tpu.memory_space<vmem>>, vector<8x128xf32>
    %c0_4 = arith.constant 0 : index
    %c384 = arith.constant 384 : index
    %10 = vector.load %arg1[%c0_4, %c384] : memref<8x512xf32, #tpu.memory_space<vmem>>, vector<8x128xf32>
    %11 = arith.subf %10, %9 : vector<8x128xf32>
    %12 = math.exp %11 : vector<8x128xf32>
    %cst_5 = arith.constant 1.000000e+00 : f32
    %13 = vector.broadcast %cst_5 : f32 to vector<8x128xf32>
    %14 = arith.addf %13, %12 : vector<8x128xf32>
    %15 = tpu.reciprocal %14 : vector<8x128xf32> -> vector<8x128xf32>
    %cst_6 = arith.constant 1.000000e+00 : f32
    %16 = vector.broadcast %cst_6 : f32 to vector<8x128xf32>
    %17 = arith.subf %16, %15 : vector<8x128xf32>
    %18 = tpu.concatenate %6, %15, %8, %17 in 1 : vector<8x128xf32>, vector<8x128xf32>, vector<8x128xf32>, vector<8x128xf32> -> vector<8x512xf32>
    %c0_7 = arith.constant 0 : index
    %c0_8 = arith.constant 0 : index
    %19 = vector.load %arg2[%c0_7, %c0_8] : memref<8x512xf32, #tpu.memory_space<vmem>>, vector<8x512xf32>
    tpu.vector_store %arg2[%c0_7, %c0_8], %18 {strides = array<i32>} : memref<8x512xf32, #tpu.memory_space<vmem>>, vector<8x512xf32>,
    return
  }
  func.func @transform_0(%arg0: i32) -> (i32, i32) {
    %c0_i32 = arith.constant 0 : i32
    %c0_i32_0 = arith.constant 0 : i32
    return %arg0, %c0_i32 : i32, i32
  }
  func.func @transform_1(%arg0: i32) -> (i32, i32) {
    %c0_i32 = arith.constant 0 : i32
    %c0_i32_0 = arith.constant 0 : i32
    return %arg0, %c0_i32 : i32, i32
  }
}

</mosaic_0001>

<bundles_post_ra>
// kernel: tpu_custom_call.1
= control target key start
LH: loop header
LB: loop body
LE: loop exit
PB: predicated region body
PF: predicated region fallthrough
CT: control target
= control target key end

     0   :  { %6 = vsyncpa [#allocation3], 0  ;;  %s579_s0 = inlined_call_operand.hbm [shape: f32[16,512], index: 0, kind: input, shape index: {}]   ;;  %s580_s1 = inlined_call_operand.hbm [shape: f32[16,512], index: 1, kind: output, shape index: {}]  }
   0x1   :  { %8 = vsyncpa [#allocation3 + $0x1], 0 }
   0x2   :  { %9 = vsyncpa [#allocation4], 0 }
   0x3   :  { %11 = vsyncpa [#allocation4 + $0x1], 0  ;;  %s418_s6 = smov 0   ;;  %s420_s7 = smov 0  }
   0x4   :  { %s422_s8 = smov 0   ;;  %s424_s9 = smov 0  }
   0x5 LB: > { %s439_s10 = sadd.s32 4294967295, %s404_s9   ;;  %s238_s11 = sadd.s32 4294967294, %s404_s9   ;;  %s404_s9 = sphi %s424_s9, %s595_s9   ;;  %s400_s8 = sphi %s422_s8, %s594_s8   ;;  %s396_s7 = sphi %s420_s7, %s593_s7   ;;  %s392_s6 = sphi %s418_s6, %s592_s6  }
   0x6   : > { %s443_s12 = sadd.s32 1, %s404_s9   ;;  %s24_s13 = sadd.s32 1, %s400_s8 }
   0x7   : > { %s21_s14 = ssub.s32 %s404_s9, %s443_s12  ;;  %p31_p0 = scmp.ne.s32.totalorder %s400_s8, %s396_s7 }
   0x8   : > { %p22_p1 = scmp.eq.s32.totalorder %s21_s14, 0  ;;  %p32_p2 = scmp.eq.s32.totalorder %s404_s9, 0 }
   0x9   : > { %p37_p3 = scmp.ne.s32.totalorder %s396_s7, %s392_s6  ;;  %p38_p4 = scmp.eq.s32.totalorder %s439_s10, 0 }
   0xa   : > { %s455_s15 = scalar_select %p22_p1, %s400_s8, %s24_s13  }
   0xb   : > { %p457_p5 = por %p32_p2, %p31_p0  ;;  %p461_p6 = por %p38_p4, %p37_p3 }
   0xc   : > { %p61_p7 = scmp.eq.s32.totalorder %s439_s10, 1  ;;  %p67_p8 = scmp.eq.s32.totalorder %s238_s11, 1 }
   0xd   : > { %p266_p10 = scmp.lt.s32.totalorder %s404_s9, 2  ;;  %s87_s20 = sand.u32 1, %s400_s8  }
   0xe   : > { %p468_p11 = por %p61_p7, %p31_p0  ;;  %p472_p12 = por %p67_p8, %p37_p3 }
   0xf   : > { %s252_s21 = sshll.u32 %s404_s9, 9  ;;  %s241_s22 = sshll.u32 %s87_s20, 5 }
  0x10   : > { %s584_s18 = scalar_select %p468_p11, 1, 0 }
  0x11   : > { %s585_s19 = scalar_select %p472_p12, 1, 0 }
  0x12   : > { %s481_s25 = scalar_lea.hbm %s579_s0, %s252_s21  ;;  %s91_s26 = scalar_lea.vmem [#allocation2], %s241_s22 }
  0x13   : > { %s99_s27 = sshll.u32 %s91_s26, 4  ;;  %p485_p13 = pnand %p266_p10, %p457_p5  ;;  %s489_s27 = int_to_ptr.vmem [resolvable:$true] %s99_s27 }
  0x14   : > { %s88_s29 = scalar_lea.sflag [#allocation3], %s87_s20  ;;  %s308_s30 = scalar_lea.hbm %s481_s25, 512 }
  0x15   : > { %p309_p2 = scmp.ne.s32.totalorder %s481_s25, %s308_s30  ;;  %p310_p3 = pneg %p485_p13 }
  0x16   : > { %s313_s4 = scalar_lea.hbm %s579_s0, 1024  ;;  %p314_p5 = scmp.lt.u32.totalorder %s481_s25, %s579_s0 }
  0x17   : > { %p311_p4 = pnand %p310_p3, %p309_p2  ;;  %p315_p8 = scmp.lt.u32.totalorder %s313_s4, %s308_s30 }
  0x18   : > { %p317_p9 = scmp.lt.u32.totalorder %s308_s30, %s481_s25 }
  0x19   : > { %p312_p7 = pneg %p311_p4  ;;  %p316_p10 = por %p315_p8, %p314_p5 }
  0x1b   : > { %p318_p0 = por %p317_p9, %p316_p10 }
  0x1d   : > { %p319_p1 = pnand %p318_p0, %p312_p7 }
  0x1f   : > { %322 = shalt.err (!%p319_p1)
}
  0x20   : > { %s323_s13 = scalar_lea.vmem %s489_s27, 512  ;;  %s406_s14 = smov [#allocation2]  }
  0x21   : > { %p324_p2 = scmp.ne.s32.totalorder %s489_s27, %s323_s13  ;;  %s328_s16 = sshll.u32 %s406_s14, 4  ;;  %s329_s16 = int_to_ptr.vmem [resolvable:$false] %s328_s16 }
  0x22   : > { %s330_s20 = scalar_lea.vmem %s329_s16, 1024  ;;  %p331_p11 = scmp.lt.s32.totalorder %s489_s27, %s329_s16 }
  0x23   : > { %p326_p4 = pnand %p324_p2, %p310_p3  ;;  %p332_p5 = scmp.lt.s32.totalorder %s330_s20, %s323_s13 }
  0x25   : > { %p327_p12 = pneg %p326_p4  ;;  %p333_p8 = por %p332_p5, %p331_p11 }
  0x27   : > { %p334_p9 = pnand %p333_p8, %p327_p12 }
  0x29   : > { %337 = shalt.err (!%p334_p9)
}
  0x2a   : > { %261 = dma.hbm_to_vmem [thread:$0]  (!%p485_p13), %s481_s25, 512, %s489_s27, %s88_s29  }
  0x2b   : > { %p587_p0 = scmp.lt.s32.totalorder %s404_s9, 3  ;;  %p588_p1 = scmp.ge.s32.totalorder %s404_s9, 1 }
  0x2d   : > { %p105_p3 = pnand %p588_p1, %p587_p0 }
  0x2e   : > { %s523_s21 = sand.u32 (!%p105_p3), 1, %s396_s7  }
  0x2f   : > { %108 = sbr.rel (%p105_p3) target bundleno = 101 (0x65), region = 24  ;;  %s245_s22 = sshll.u32 (!%p105_p3), %s523_s21, 5 }
  0x30   : > { %s111_s23 = scalar_lea.sflag (!%p105_p3), [#allocation3], %s523_s21  ;;  %s114_s24 = scalar_lea.vmem (!%p105_p3), [#allocation2], %s245_s22 }
  0x36   : > { %383 = dma.done.wait (%p461_p6), %s111_s23, 512  }
  0x37   : > { %385 = vsyncadd (%p461_p6), %s111_s23, 4294966784  ;;  %v133_v0 = vld [vmem:[%s114_s24] sm:$0xff]  ;;  %v134_v1 = vld [vmem:[%s114_s24 + $0x8] sm:$0xff]  ;;  %s132_s17 = scalar_lea.vmem [#allocation5], %s245_s22  ;;  %s253_s26 = sshll.u32 %s439_s10, 9 }
  0x38   : > { %v141_v2 = vld [vmem:[%s114_s24 + $0x10] sm:$0xff]  ;;  %v135_v3 = vsub.f32 %v134_v1, %v133_v0  ;;  %v142_v4 = vld [vmem:[%s114_s24 + $0x18] sm:$0xff]  ;;  %s168_s25 = sshll.u32 %s132_s17, 4  ;;  %s537_s29 = scalar_lea.hbm %s580_s1, %s253_s26  ;;  %s532_s25 = int_to_ptr.vmem [resolvable:$true] %s168_s25 }
  0x39   : > { %v143_v5 = vsub.f32 %v142_v4, %v141_v2  ;;  %s154_s30 = scalar_lea.sflag [#allocation4], %s523_s21  ;;  %s338_s10 = scalar_lea.vmem %s532_s25, 512 }
  0x3a   : > { %v136_v6 = vmul.f32 1.442695, %v135_v3  ;;  %p339_p6 = scmp.ne.s32.totalorder %s532_s25, %s338_s10  ;;  %p589_p11 = scmp.ne.s32.totalorder %s584_s18, 0 }
  0x3b   : > { %v144_v7 = vmul.f32 1.442695, %v143_v5  ;;  %s407_s2 = smov [#allocation5]  }
  0x3c   : > { %300 = vpow2.f32 %v136_v6  ;;  %p340_p12 = pnand %p339_p6, %p589_p11  ;;  %s342_s3 = sshll.u32 %s407_s2, 4  ;;  %s343_s3 = int_to_ptr.vmem [resolvable:$false] %s342_s3 }
  0x3d   : > { %302 = vpow2.f32 %v144_v7  ;;  %s344_s4 = scalar_lea.vmem %s343_s3, 1024  ;;  %p345_p7 = scmp.lt.s32.totalorder %s532_s25, %s343_s3 }
  0x3e   : > { %p341_p13 = pneg %p340_p12  ;;  %p346_p10 = scmp.lt.s32.totalorder %s344_s4, %s338_s10 }
  0x40   : > { %p347_p2 = por %p346_p10, %p345_p7 }
  0x42   : > { %p348_p4 = pnand %p347_p2, %p341_p13 }
  0x46   : > { %v301_v8 = vpop.eup %300 }
  0x47   : > { %v303_v9 = vpop.eup %302  ;;  %v138_v10 = vadd.f32 1.0, %v301_v8 }
  0x48   : > { %v146_v11 = vadd.f32 1.0, %v303_v9 }
  0x49   : > { %304 = vrcp.f32 %v138_v10 }
  0x4a   : > { %306 = vrcp.f32 %v146_v11 }
  0x53   : > { %v305_v12 = vpop.eup %304 }
  0x54   : > { %v307_v13 = vpop.eup %306  ;;  %149 = vst [vmem:[%s132_s17] sm:$0xff] %v305_v12  ;;  %v140_v14 = vsub.f32 1.0, %v305_v12 }
  0x55   : > { %150 = vst [vmem:[%s132_s17 + $0x8] sm:$0xff] %v307_v13  ;;  %v148_v15 = vsub.f32 1.0, %v307_v13 }
  0x56   : > { %151 = vst [vmem:[%s132_s17 + $0x10] sm:$0xff] %v140_v14 }
  0x57   : > { %152 = vst [vmem:[%s132_s17 + $0x18] sm:$0xff] %v148_v15 }
  0x58   : > { %351 = shalt.err (!%p348_p4)
}
  0x59   : > { %s352_s5 = scalar_lea.hbm %s537_s29, 512  ;;  %s356_s14 = scalar_lea.hbm %s580_s1, 1024 }
  0x5a   : > { %p353_p5 = scmp.ne.s32.totalorder %s537_s29, %s352_s5  ;;  %p357_p0 = scmp.lt.u32.totalorder %s537_s29, %s580_s1 }
  0x5b   : > { %p358_p1 = scmp.lt.u32.totalorder %s356_s14, %s352_s5  ;;  %p360_p6 = scmp.lt.u32.totalorder %s352_s5, %s537_s29 }
  0x5c   : > { %p354_p8 = pnand %p353_p5, %p589_p11 }
  0x5d   : > { %p359_p3 = por %p358_p1, %p357_p0 }
  0x5e   : > { %p355_p9 = pneg %p354_p8 }
  0x5f   : > { %p361_p12 = por %p360_p6, %p359_p3 }
  0x61   : > { %p362_p13 = pnand %p361_p12, %p355_p9 }
  0x63   : > { %365 = shalt.err (!%p362_p13)
}
  0x64   : > { %256 = dma.vmem_to_hbm [thread:$0]  (%p589_p11), %s532_s25, 512, %s537_s29, %s154_s30  }
  0x65 PF: > { %s180_s21 = sand.u32 1, %s392_s6   ;;  %p590_p7 = scmp.ne.s32.totalorder %s585_s19, 0 }
  0x66   : > { %p591_p10 = scmp.ge.s32.totalorder %s404_s9, 2  ;;  %s181_s22 = scalar_lea.sflag [#allocation4], %s180_s21 }
  0x68   : > { %p263_p2 = pnand %p591_p10, %p590_p7 }
  0x6a   : > { %387 = dma.done.wait (!%p263_p2), %s181_s22, 512  }
  0x6b   : > { %389 = vsyncadd (!%p263_p2), %s181_s22, 4294966784  ;;  %p14_p4 = scmp.ge.s32.totalorder %s443_s12, 4   ;;  %s592_s6 = smov %s396_s7 }
  0x6c   : > { %s593_s7 = smov %s400_s8  ;;  %s594_s8 = smov %s455_s15 }
  0x6d   : > { %s595_s9 = smov %s443_s12  ;;  %16 = sbr.rel (!%p14_p4) target bundleno = 5 (0x5), region = 69 }
  0x74   :  { %186 = vsyncpa [#allocation3], 1 }
  0x75   :  { %188 = vsyncpa [#allocation3 + $0x1], 1 }
  0x76   :  { %189 = vsyncpa [#allocation4], 1 }
  0x77   :  { %191 = vsyncpa [#allocation4 + $0x1], 1 }

</bundles_post_ra>
